<compile_context>
chip_gen: v7x
topology: tpu7x:2x2x1
jax: 0.10.0
libtpu: 0.0.40
codegen_flags: <defaults>
</compile_context>

<pallas_src>
import jax
import jax.numpy as jnp
from jax import lax
from jax.experimental import pallas as pl
from jax.experimental.pallas import tpu as pltpu  # noqa: F401  (TPU backend)

# v6e/v7x optional: set to jnp.bfloat16 for single-pass MXU matmuls (keep all
# gate / c / h elementwise math in f32).  Left at f32 so the recurrent error
# accumulation cannot break the 2e-3 correctness tolerance (and v5e has no
# bf16 VPU/EUP path anyway).
_MXU_DTYPE = jnp.float32


def _lstm_l1norm_kernel(x_ref, w_ref, out_ref):
    """Fused LSTM recurrence + per-row L1 normalization.

    x_ref:   (seq, H)        inputs, batch squeezed
    w_ref:   (2H+2, 4H)      [W_ih^T ; W_hh^T ; bias ; (h0 | c0 | 0)]
                             with gate columns pre-permuted to (i, f, o, g)
    out_ref: (seq+2, H)      rows 0..seq-1 = g, row seq = h_n, row seq+1 = c_n
    """
    seq, H = x_ref.shape

    wih = w_ref[0:H, :]                       # (H, 4H)
    whh = w_ref[H:2 * H, :]                   # (H, 4H)
    b = w_ref[2 * H:2 * H + 1, :]             # (1, 4H)  (b_ih + b_hh folded)
    state = w_ref[2 * H + 1:2 * H + 2, :]     # (1, 4H)
    h = state[:, 0:H]                         # (1, H)
    c = state[:, H:2 * H]                     # (1, H)

    # Hoisted non-recurrent projection for ALL timesteps + folded bias:
    # one (seq, H) @ (H, 4H) MXU matmul instead of `seq` tiny ones.
    xw = jnp.dot(x_ref[...].astype(_MXU_DTYPE), wih.astype(_MXU_DTYPE),
                 preferred_element_type=jnp.float32) + b     # (seq, 4H) f32

    # seq is a small compile-time constant -> fully unrolled recurrence; the
    # only per-step MXU work is the recurrent h @ W_hh^T.
    for t in range(seq):
        gates = xw[t:t + 1, :] + jnp.dot(h.astype(_MXU_DTYPE),
                                         whh.astype(_MXU_DTYPE),
                                         preferred_element_type=jnp.float32)
        # Permuted gate order (i, f, o, g): one sigmoid over 3H lanes, one
        # tanh over H lanes (2 EUP pushes per step instead of 4).
        sig = jax.nn.sigmoid(gates[:, 0:3 * H])
        i_g = sig[:, 0:H]
        f_g = sig[:, H:2 * H]
        o_g = sig[:, 2 * H:3 * H]
        g_g = jnp.tanh(gates[:, 3 * H:4 * H])

        c = f_g * c + i_g * g_g
        h = o_g * jnp.tanh(c)

        # L1 norm over dim=1 (batch of size 1) == elementwise |g_hat|, so
        # g = g_hat / |g_hat| (exactly +-1; 0 -> NaN, matching PyTorch).
        # Stored per step on the idle vst slot -> no concat / epilogue tail.
        out_ref[t:t + 1, :] = h / jnp.abs(h)

    # Final hidden state written exactly once, into the same output slab.
    out_ref[seq:seq + 1, :] = h
    out_ref[seq + 1:seq + 2, :] = c


def prepare_manager_params(w_ih, w_hh, b_ih, b_hh):
    """Once-per-parameter-update prep (hoisted out of the per-call path).

    Returns a (2*H + 1, 4*H) f32 slab: rows 0..H-1 = W_ih^T, rows H..2H-1 =
    W_hh^T, row 2H = b_ih + b_hh, with gate column blocks permuted from
    PyTorch's (i, f, g, o) to (i, f, o, g).
    """
    H = w_ih.shape[1]

    def perm_t(w):                                   # (4H, H) -> (H, 4H)
        wt = jnp.asarray(w, jnp.float32).T
        return jnp.concatenate([wt[:, :2 * H],        # i, f
                                wt[:, 3 * H:4 * H],   # o
                                wt[:, 2 * H:3 * H]],  # g
                               axis=1)

    b = jnp.asarray(b_ih, jnp.float32) + jnp.asarray(b_hh, jnp.float32)
    b_p = jnp.concatenate([b[:2 * H], b[3 * H:4 * H],
                           b[2 * H:3 * H]]).reshape(1, 4 * H)
    return jnp.concatenate([perm_t(w_ih), perm_t(w_hh), b_p], axis=0)


@jax.jit
def manager_base_forward(inputs, hidden, prepped_params):
    """Pallas implementation of ManagerBase.forward.

    inputs:         (seq_len, 1, g_dim) float32
    hidden:         tuple (h0, c0), each (1, 1, g_dim) float32
    prepped_params: (2*g_dim + 1, 4*g_dim) slab from prepare_manager_params
    Returns (m_v=None, g, (h_n, c_n)).
    """
    h0, c0 = hidden
    seq, bsz, H = inputs.shape
    assert bsz == 1, "ManagerBase uses a batch-1 LSTM hidden state"

    x2d = jnp.asarray(inputs, jnp.float32).reshape(seq, H)

    # Pack (h0 | c0) into one extra slab row -> kernel has exactly 2 inputs.
    state_row = jnp.zeros((1, 4 * H), jnp.float32)
    state_row = lax.dynamic_update_slice(state_row, h0.reshape(1, H), (0, 0))
    state_row = lax.dynamic_update_slice(state_row, c0.reshape(1, H), (0, H))
    slab = jnp.concatenate([prepped_params, state_row], axis=0)  # (2H+2, 4H)

    # Single invocation, no grid: everything lives in VMEM (tiny footprint).
    out = pl.pallas_call(
        _lstm_l1norm_kernel,
        out_shape=jax.ShapeDtypeStruct((seq + 2, H), jnp.float32),
    )(x2d, slab)

    g = out[:seq].reshape(seq, 1, H)
    h_n = out[seq:seq + 1].reshape(1, 1, H)
    c_n = out[seq + 1:seq + 2].reshape(1, 1, H)
    m_v = None   # TODO(synk): ManagerBase never computes m_v in forward; stays None.
    return m_v, g, (h_n, c_n)


def _reference_forward(inputs, hidden, w_ih, w_hh, b_ih, b_hh):
    """Pure-JAX reference matching PyTorch nn.LSTM + L1 normalization."""
    h = hidden[0][0]  # (1, H)
    c = hidden[1][0]  # (1, H)
    H = h.shape[-1]
    b = b_ih + b_hh

    def step(carry, x_t):
        h, c = carry
        gates = (x_t @ w_ih.T + h @ w_hh.T + b)
        i_g = jax.nn.sigmoid(gates[:, 0:H])
        f_g = jax.nn.sigmoid(gates[:, H:2 * H])
        g_g = jnp.tanh(gates[:, 2 * H:3 * H])
        o_g = jax.nn.sigmoid(gates[:, 3 * H:4 * H])
        c_new = f_g * c + i_g * g_g
        h_new = o_g * jnp.tanh(c_new)
        return (h_new, c_new), h_new

    (h_n, c_n), g_hat = lax.scan(step, (h, c), inputs)   # g_hat: (T, 1, H)
    g = g_hat / jnp.sum(jnp.abs(g_hat), axis=1, keepdims=True)
    return g, h_n[None], c_n[None]


if __name__ == "__main__":
    seq_len = 8
    g_dim = 32          # hidden_dim == g_dim in ManagerBase

    key = jax.random.PRNGKey(0)
    k_x, k_wih, k_whh, k_bih, k_bhh = jax.random.split(key, 5)

    # Deterministic synthetic LSTM parameters (nn.LSTM(g_dim, g_dim) shapes).
    w_ih = 0.1 * jax.random.normal(k_wih, (4 * g_dim, g_dim), jnp.float32)
    w_hh = 0.1 * jax.random.normal(k_whh, (4 * g_dim, g_dim), jnp.float32)
    b_ih = 0.1 * jax.random.normal(k_bih, (4 * g_dim,), jnp.float32)
    b_hh = 0.1 * jax.random.normal(k_bhh, (4 * g_dim,), jnp.float32)

    # Inputs: (seq_len, batch=1, g_dim); hidden state from _init_hidden (zeros).
    inputs = jax.random.normal(k_x, (seq_len, 1, g_dim), jnp.float32)
    hidden = (jnp.zeros((1, 1, g_dim), jnp.float32),
              jnp.zeros((1, 1, g_dim), jnp.float32))

    # Hoisted parameter prep (done once per weight update, not per call).
    prepped = prepare_manager_params(w_ih, w_hh, b_ih, b_hh)

    m_v, g, (h_n, c_n) = manager_base_forward(inputs, hidden, prepped)
    jax.block_until_ready((g, h_n, c_n))

    # Correctness check against a pure-JAX reference.
    g_ref, h_ref, c_ref = _reference_forward(inputs, hidden,
                                             w_ih, w_hh, b_ih, b_hh)
    assert g.shape == (seq_len, 1, g_dim)
    assert h_n.shape == (1, 1, g_dim) and c_n.shape == (1, 1, g_dim)
    assert jnp.allclose(g, g_ref, atol=2e-3, rtol=2e-3)
    assert jnp.allclose(h_n, h_ref, atol=2e-3, rtol=2e-3)
    assert jnp.allclose(c_n, c_ref, atol=2e-3, rtol=2e-3)
    assert m_v is None

    print("KERNEL_OK")
</pallas_src>

<mosaic_0001>
module attributes {stable_mosaic.version = 11 : i64} {
  func.func @_lstm_l1norm_kernel(%arg0: memref<8x32xf32, #tpu.memory_space<vmem>>, %arg1: memref<66x128xf32, #tpu.memory_space<vmem>>, %arg2: memref<10x32xf32, #tpu.memory_space<vmem>>) attributes {dimension_semantics = [], scalar_prefetch = 0 : i64, scratch_operands = 0 : i64, tpu.core_type = #tpu.core_type<tc>} {
    %c0 = arith.constant 0 : index
    %c0_0 = arith.constant 0 : index
    %0 = vector.load %arg1[%c0, %c0_0] : memref<66x128xf32, #tpu.memory_space<vmem>>, vector<32x128xf32>
    %c32 = arith.constant 32 : index
    %c0_1 = arith.constant 0 : index
    %1 = vector.load %arg1[%c32, %c0_1] : memref<66x128xf32, #tpu.memory_space<vmem>>, vector<32x128xf32>
    %c64 = arith.constant 64 : index
    %c0_2 = arith.constant 0 : index
    %2 = vector.load %arg1[%c64, %c0_2] : memref<66x128xf32, #tpu.memory_space<vmem>>, vector<1x128xf32>
    %c65 = arith.constant 65 : index
    %c0_3 = arith.constant 0 : index
    %3 = vector.load %arg1[%c65, %c0_3] : memref<66x128xf32, #tpu.memory_space<vmem>>, vector<1x128xf32>
    %4 = vector.extract_strided_slice %3 {offsets = [0, 0], sizes = [1, 32], strides = [1, 1]} : vector<1x128xf32> to vector<1x32xf32>
    %5 = vector.extract_strided_slice %3 {offsets = [0, 32], sizes = [1, 32], strides = [1, 1]} : vector<1x128xf32> to vector<1x32xf32>
    %c0_4 = arith.constant 0 : index
    %c0_5 = arith.constant 0 : index
    %6 = vector.load %arg0[%c0_4, %c0_5] : memref<8x32xf32, #tpu.memory_space<vmem>>, vector<8x32xf32>
    %cst = arith.constant dense<0.000000e+00> : vector<8x128xf32>
    %7 = tpu.matmul %6, %0, %cst {dimension_numbers = #tpu.dot_dimension_numbers<[1], [0], [0], [1], [0, 0, 1, 1], [], []>} : vector<8x32xf32>, vector<32x128xf32>, vector<8x128xf32> -> vector<8x128xf32>
    %8 = vector.broadcast %2 : vector<1x128xf32> to vector<8x128xf32>
    %9 = arith.addf %7, %8 : vector<8x128xf32>
    %10 = vector.extract_strided_slice %9 {offsets = [0, 0], sizes = [1, 128], strides = [1, 1]} : vector<8x128xf32> to vector<1x128xf32>
    %cst_6 = arith.constant dense<0.000000e+00> : vector<1x128xf32>
    %11 = tpu.matmul %4, %1, %cst_6 {dimension_numbers = #tpu.dot_dimension_numbers<[1], [0], [0], [1], [0, 0, 1, 1], [], []>} : vector<1x32xf32>, vector<32x128xf32>, vector<1x128xf32> -> vector<1x128xf32>
    %12 = arith.addf %10, %11 : vector<1x128xf32>
    %13 = vector.extract_strided_slice %12 {offsets = [0, 0], sizes = [1, 96], strides = [1, 1]} : vector<1x128xf32> to vector<1x96xf32>
    %14 = arith.negf %13 : vector<1x96xf32>
    %15 = math.exp %14 : vector<1x96xf32>
    %cst_7 = arith.constant 1.000000e+00 : f32
    %16 = vector.broadcast %cst_7 : f32 to vector<1x96xf32>
    %17 = arith.addf %16, %15 : vector<1x96xf32>
    %18 = arith.divf %16, %17 : vector<1x96xf32>
    %19 = vector.extract_strided_slice %18 {offsets = [0, 0], sizes = [1, 32], strides = [1, 1]} : vector<1x96xf32> to vector<1x32xf32>
    %20 = vector.extract_strided_slice %18 {offsets = [0, 32], sizes = [1, 32], strides = [1, 1]} : vector<1x96xf32> to vector<1x32xf32>
    %21 = vector.extract_strided_slice %18 {offsets = [0, 64], sizes = [1, 32], strides = [1, 1]} : vector<1x96xf32> to vector<1x32xf32>
    %22 = vector.extract_strided_slice %12 {offsets = [0, 96], sizes = [1, 32], strides = [1, 1]} : vector<1x128xf32> to vector<1x32xf32>
    %23 = math.tanh %22 : vector<1x32xf32>
    %24 = arith.mulf %20, %5 : vector<1x32xf32>
    %25 = arith.mulf %19, %23 : vector<1x32xf32>
    %26 = arith.addf %24, %25 : vector<1x32xf32>
    %27 = math.tanh %26 : vector<1x32xf32>
    %28 = arith.mulf %21, %27 : vector<1x32xf32>
    %29 = math.absf %28 : vector<1x32xf32>
    %30 = arith.divf %28, %29 : vector<1x32xf32>
    %c0_8 = arith.constant 0 : index
    %c0_9 = arith.constant 0 : index
    %31 = vector.load %arg2[%c0_8, %c0_9] : memref<10x32xf32, #tpu.memory_space<vmem>>, vector<1x32xf32>
    tpu.vector_store %arg2[%c0_8, %c0_9], %30 {strides = array<i32>} : memref<10x32xf32, #tpu.memory_space<vmem>>, vector<1x32xf32>,
    %32 = vector.extract_strided_slice %9 {offsets = [1, 0], sizes = [1, 128], strides = [1, 1]} : vector<8x128xf32> to vector<1x128xf32>
    %cst_10 = arith.constant dense<0.000000e+00> : vector<1x128xf32>
    %33 = tpu.matmul %28, %1, %cst_10 {dimension_numbers = #tpu.dot_dimension_numbers<[1], [0], [0], [1], [0, 0, 1, 1], [], []>} : vector<1x32xf32>, vector<32x128xf32>, vector<1x128xf32> -> vector<1x128xf32>
    %34 = arith.addf %32, %33 : vector<1x128xf32>
    %35 = vector.extract_strided_slice %34 {offsets = [0, 0], sizes = [1, 96], strides = [1, 1]} : vector<1x128xf32> to vector<1x96xf32>
    %36 = arith.negf %35 : vector<1x96xf32>
    %37 = math.exp %36 : vector<1x96xf32>
    %cst_11 = arith.constant 1.000000e+00 : f32
    %38 = vector.broadcast %cst_11 : f32 to vector<1x96xf32>
    %39 = arith.addf %38, %37 : vector<1x96xf32>
    %40 = arith.divf %38, %39 : vector<1x96xf32>
    %41 = vector.extract_strided_slice %40 {offsets = [0, 0], sizes = [1, 32], strides = [1, 1]} : vector<1x96xf32> to vector<1x32xf32>
    %42 = vector.extract_strided_slice %40 {offsets = [0, 32], sizes = [1, 32], strides = [1, 1]} : vector<1x96xf32> to vector<1x32xf32>
    %43 = vector.extract_strided_slice %40 {offsets = [0, 64], sizes = [1, 32], strides = [1, 1]} : vector<1x96xf32> to vector<1x32xf32>
    %44 = vector.extract_strided_slice %34 {offsets = [0, 96], sizes = [1, 32], strides = [1, 1]} : vector<1x128xf32> to vector<1x32xf32>
    %45 = math.tanh %44 : vector<1x32xf32>
    %46 = arith.mulf %42, %26 : vector<1x32xf32>
    %47 = arith.mulf %41, %45 : vector<1x32xf32>
    %48 = arith.addf %46, %47 : vector<1x32xf32>
    %49 = math.tanh %48 : vector<1x32xf32>
    %50 = arith.mulf %43, %49 : vector<1x32xf32>
    %51 = math.absf %50 : vector<1x32xf32>
    %52 = arith.divf %50, %51 : vector<1x32xf32>
    %c1 = arith.constant 1 : index
    %c0_12 = arith.constant 0 : index
    %53 = vector.load %arg2[%c1, %c0_12] : memref<10x32xf32, #tpu.memory_space<vmem>>, vector<1x32xf32>
    tpu.vector_store %arg2[%c1, %c0_12], %52 {strides = array<i32>} : memref<10x32xf32, #tpu.memory_space<vmem>>, vector<1x32xf32>,
    %54 = vector.extract_strided_slice %9 {offsets = [2, 0], sizes = [1, 128], strides = [1, 1]} : vector<8x128xf32> to vector<1x128xf32>
    %cst_13 = arith.constant dense<0.000000e+00> : vector<1x128xf32>
    %55 = tpu.matmul %50, %1, %cst_13 {dimension_numbers = #tpu.dot_dimension_numbers<[1], [0], [0], [1], [0, 0, 1, 1], [], []>} : vector<1x32xf32>, vector<32x128xf32>, vector<1x128xf32> -> vector<1x128xf32>
    %56 = arith.addf %54, %55 : vector<1x128xf32>
    %57 = vector.extract_strided_slice %56 {offsets = [0, 0], sizes = [1, 96], strides = [1, 1]} : vector<1x128xf32> to vector<1x96xf32>
    %58 = arith.negf %57 : vector<1x96xf32>
    %59 = math.exp %58 : vector<1x96xf32>
    %cst_14 = arith.constant 1.000000e+00 : f32
    %60 = vector.broadcast %cst_14 : f32 to vector<1x96xf32>
    %61 = arith.addf %60, %59 : vector<1x96xf32>
    %62 = arith.divf %60, %61 : vector<1x96xf32>
    %63 = vector.extract_strided_slice %62 {offsets = [0, 0], sizes = [1, 32], strides = [1, 1]} : vector<1x96xf32> to vector<1x32xf32>
    %64 = vector.extract_strided_slice %62 {offsets = [0, 32], sizes = [1, 32], strides = [1, 1]} : vector<1x96xf32> to vector<1x32xf32>
    %65 = vector.extract_strided_slice %62 {offsets = [0, 64], sizes = [1, 32], strides = [1, 1]} : vector<1x96xf32> to vector<1x32xf32>
    %66 = vector.extract_strided_slice %56 {offsets = [0, 96], sizes = [1, 32], strides = [1, 1]} : vector<1x128xf32> to vector<1x32xf32>
    %67 = math.tanh %66 : vector<1x32xf32>
    %68 = arith.mulf %64, %48 : vector<1x32xf32>
    %69 = arith.mulf %63, %67 : vector<1x32xf32>
    %70 = arith.addf %68, %69 : vector<1x32xf32>
    %71 = math.tanh %70 : vector<1x32xf32>
    %72 = arith.mulf %65, %71 : vector<1x32xf32>
    %73 = math.absf %72 : vector<1x32xf32>
    %74 = arith.divf %72, %73 : vector<1x32xf32>
    %c2 = arith.constant 2 : index
    %c0_15 = arith.constant 0 : index
    %75 = vector.load %arg2[%c2, %c0_15] : memref<10x32xf32, #tpu.memory_space<vmem>>, vector<1x32xf32>
    tpu.vector_store %arg2[%c2, %c0_15], %74 {strides = array<i32>} : memref<10x32xf32, #tpu.memory_space<vmem>>, vector<1x32xf32>,
    %76 = vector.extract_strided_slice %9 {offsets = [3, 0], sizes = [1, 128], strides = [1, 1]} : vector<8x128xf32> to vector<1x128xf32>
    %cst_16 = arith.constant dense<0.000000e+00> : vector<1x128xf32>
    %77 = tpu.matmul %72, %1, %cst_16 {dimension_numbers = #tpu.dot_dimension_numbers<[1], [0], [0], [1], [0, 0, 1, 1], [], []>} : vector<1x32xf32>, vector<32x128xf32>, vector<1x128xf32> -> vector<1x128xf32>
    %78 = arith.addf %76, %77 : vector<1x128xf32>
    %79 = vector.extract_strided_slice %78 {offsets = [0, 0], sizes = [1, 96], strides = [1, 1]} : vector<1x128xf32> to vector<1x96xf32>
    %80 = arith.negf %79 : vector<1x96xf32>
    %81 = math.exp %80 : vector<1x96xf32>
    %cst_17 = arith.constant 1.000000e+00 : f32
    %82 = vector.broadcast %cst_17 : f32 to vector<1x96xf32>
    %83 = arith.addf %82, %81 : vector<1x96xf32>
    %84 = arith.divf %82, %83 : vector<1x96xf32>
    %85 = vector.extract_strided_slice %84 {offsets = [0, 0], sizes = [1, 32], strides = [1, 1]} : vector<1x96xf32> to vector<1x32xf32>
    %86 = vector.extract_strided_slice %84 {offsets = [0, 32], sizes = [1, 32], strides = [1, 1]} : vector<1x96xf32> to vector<1x32xf32>
    %87 = vector.extract_strided_slice %84 {offsets = [0, 64], sizes = [1, 32], strides = [1, 1]} : vector<1x96xf32> to vector<1x32xf32>
    %88 = vector.extract_strided_slice %78 {offsets = [0, 96], sizes = [1, 32], strides = [1, 1]} : vector<1x128xf32> to vector<1x32xf32>
    %89 = math.tanh %88 : vector<1x32xf32>
    %90 = arith.mulf %86, %70 : vector<1x32xf32>
    %91 = arith.mulf %85, %89 : vector<1x32xf32>
    %92 = arith.addf %90, %91 : vector<1x32xf32>
    %93 = math.tanh %92 : vector<1x32xf32>
    %94 = arith.mulf %87, %93 : vector<1x32xf32>
    %95 = math.absf %94 : vector<1x32xf32>
    %96 = arith.divf %94, %95 : vector<1x32xf32>
    %c3 = arith.constant 3 : index
    %c0_18 = arith.constant 0 : index
    %97 = vector.load %arg2[%c3, %c0_18] : memref<10x32xf32, #tpu.memory_space<vmem>>, vector<1x32xf32>
    tpu.vector_store %arg2[%c3, %c0_18], %96 {strides = array<i32>} : memref<10x32xf32, #tpu.memory_space<vmem>>, vector<1x32xf32>,
    %98 = vector.extract_strided_slice %9 {offsets = [4, 0], sizes = [1, 128], strides = [1, 1]} : vector<8x128xf32> to vector<1x128xf32>
    %cst_19 = arith.constant dense<0.000000e+00> : vector<1x128xf32>
    %99 = tpu.matmul %94, %1, %cst_19 {dimension_numbers = #tpu.dot_dimension_numbers<[1], [0], [0], [1], [0, 0, 1, 1], [], []>} : vector<1x32xf32>, vector<32x128xf32>, vector<1x128xf32> -> vector<1x128xf32>
    %100 = arith.addf %98, %99 : vector<1x128xf32>
    %101 = vector.extract_strided_slice %100 {offsets = [0, 0], sizes = [1, 96], strides = [1, 1]} : vector<1x128xf32> to vector<1x96xf32>
    %102 = arith.negf %101 : vector<1x96xf32>
    %103 = math.exp %102 : vector<1x96xf32>
    %cst_20 = arith.constant 1.000000e+00 : f32
    %104 = vector.broadcast %cst_20 : f32 to vector<1x96xf32>
    %105 = arith.addf %104, %103 : vector<1x96xf32>
    %106 = arith.divf %104, %105 : vector<1x96xf32>
    %107 = vector.extract_strided_slice %106 {offsets = [0, 0], sizes = [1, 32], strides = [1, 1]} : vector<1x96xf32> to vector<1x32xf32>
    %108 = vector.extract_strided_slice %106 {offsets = [0, 32], sizes = [1, 32], strides = [1, 1]} : vector<1x96xf32> to vector<1x32xf32>
    %109 = vector.extract_strided_slice %106 {offsets = [0, 64], sizes = [1, 32], strides = [1, 1]} : vector<1x96xf32> to vector<1x32xf32>
    %110 = vector.extract_strided_slice %100 {offsets = [0, 96], sizes = [1, 32], strides = [1, 1]} : vector<1x128xf32> to vector<1x32xf32>
    %111 = math.tanh %110 : vector<1x32xf32>
    %112 = arith.mulf %108, %92 : vector<1x32xf32>
    %113 = arith.mulf %107, %111 : vector<1x32xf32>
    %114 = arith.addf %112, %113 : vector<1x32xf32>
    %115 = math.tanh %114 : vector<1x32xf32>
    %116 = arith.mulf %109, %115 : vector<1x32xf32>
    %117 = math.absf %116 : vector<1x32xf32>
    %118 = arith.divf %116, %117 : vector<1x32xf32>
    %c4 = arith.constant 4 : index
    %c0_21 = arith.constant 0 : index
    %119 = vector.load %arg2[%c4, %c0_21] : memref<10x32xf32, #tpu.memory_space<vmem>>, vector<1x32xf32>
    tpu.vector_store %arg2[%c4, %c0_21], %118 {strides = array<i32>} : memref<10x32xf32, #tpu.memory_space<vmem>>, vector<1x32xf32>,
    %120 = vector.extract_strided_slice %9 {offsets = [5, 0], sizes = [1, 128], strides = [1, 1]} : vector<8x128xf32> to vector<1x128xf32>
    %cst_22 = arith.constant dense<0.000000e+00> : vector<1x128xf32>
    %121 = tpu.matmul %116, %1, %cst_22 {dimension_numbers = #tpu.dot_dimension_numbers<[1], [0], [0], [1], [0, 0, 1, 1], [], []>} : vector<1x32xf32>, vector<32x128xf32>, vector<1x128xf32> -> vector<1x128xf32>
    %122 = arith.addf %120, %121 : vector<1x128xf32>
    %123 = vector.extract_strided_slice %122 {offsets = [0, 0], sizes = [1, 96], strides = [1, 1]} : vector<1x128xf32> to vector<1x96xf32>
    %124 = arith.negf %123 : vector<1x96xf32>
    %125 = math.exp %124 : vector<1x96xf32>
    %cst_23 = arith.constant 1.000000e+00 : f32
    %126 = vector.broadcast %cst_23 : f32 to vector<1x96xf32>
    %127 = arith.addf %126, %125 : vector<1x96xf32>
    %128 = arith.divf %126, %127 : vector<1x96xf32>
    %129 = vector.extract_strided_slice %128 {offsets = [0, 0], sizes = [1, 32], strides = [1, 1]} : vector<1x96xf32> to vector<1x32xf32>
    %130 = vector.extract_strided_slice %128 {offsets = [0, 32], sizes = [1, 32], strides = [1, 1]} : vector<1x96xf32> to vector<1x32xf32>
    %131 = vector.extract_strided_slice %128 {offsets = [0, 64], sizes = [1, 32], strides = [1, 1]} : vector<1x96xf32> to vector<1x32xf32>
    %132 = vector.extract_strided_slice %122 {offsets = [0, 96], sizes = [1, 32], strides = [1, 1]} : vector<1x128xf32> to vector<1x32xf32>
    %133 = math.tanh %132 : vector<1x32xf32>
    %134 = arith.mulf %130, %114 : vector<1x32xf32>
    %135 = arith.mulf %129, %133 : vector<1x32xf32>
    %136 = arith.addf %134, %135 : vector<1x32xf32>
    %137 = math.tanh %136 : vector<1x32xf32>
    %138 = arith.mulf %131, %137 : vector<1x32xf32>
    %139 = math.absf %138 : vector<1x32xf32>
    %140 = arith.divf %138, %139 : vector<1x32xf32>
    %c5 = arith.constant 5 : index
    %c0_24 = arith.constant 0 : index
    %141 = vector.load %arg2[%c5, %c0_24] : memref<10x32xf32, #tpu.memory_space<vmem>>, vector<1x32xf32>
    tpu.vector_store %arg2[%c5, %c0_24], %140 {strides = array<i32>} : memref<10x32xf32, #tpu.memory_space<vmem>>, vector<1x32xf32>,
    %142 = vector.extract_strided_slice %9 {offsets = [6, 0], sizes = [1, 128], strides = [1, 1]} : vector<8x128xf32> to vector<1x128xf32>
    %cst_25 = arith.constant dense<0.000000e+00> : vector<1x128xf32>
    %143 = tpu.matmul %138, %1, %cst_25 {dimension_numbers = #tpu.dot_dimension_numbers<[1], [0], [0], [1], [0, 0, 1, 1], [], []>} : vector<1x32xf32>, vector<32x128xf32>, vector<1x128xf32> -> vector<1x128xf32>
    %144 = arith.addf %142, %143 : vector<1x128xf32>
    %145 = vector.extract_strided_slice %144 {offsets = [0, 0], sizes = [1, 96], strides = [1, 1]} : vector<1x128xf32> to vector<1x96xf32>
    %146 = arith.negf %145 : vector<1x96xf32>
    %147 = math.exp %146 : vector<1x96xf32>
    %cst_26 = arith.constant 1.000000e+00 : f32
    %148 = vector.broadcast %cst_26 : f32 to vector<1x96xf32>
    %149 = arith.addf %148, %147 : vector<1x96xf32>
    %150 = arith.divf %148, %149 : vector<1x96xf32>
    %151 = vector.extract_strided_slice %150 {offsets = [0, 0], sizes = [1, 32], strides = [1, 1]} : vector<1x96xf32> to vector<1x32xf32>
    %152 = vector.extract_strided_slice %150 {offsets = [0, 32], sizes = [1, 32], strides = [1, 1]} : vector<1x96xf32> to vector<1x32xf32>
    %153 = vector.extract_strided_slice %150 {offsets = [0, 64], sizes = [1, 32], strides = [1, 1]} : vector<1x96xf32> to vector<1x32xf32>
    %154 = vector.extract_strided_slice %144 {offsets = [0, 96], sizes = [1, 32], strides = [1, 1]} : vector<1x128xf32> to vector<1x32xf32>
    %155 = math.tanh %154 : vector<1x32xf32>
    %156 = arith.mulf %152, %136 : vector<1x32xf32>
    %157 = arith.mulf %151, %155 : vector<1x32xf32>
    %158 = arith.addf %156, %157 : vector<1x32xf32>
    %159 = math.tanh %158 : vector<1x32xf32>
    %160 = arith.mulf %153, %159 : vector<1x32xf32>
    %161 = math.absf %160 : vector<1x32xf32>
    %162 = arith.divf %160, %161 : vector<1x32xf32>
    %c6 = arith.constant 6 : index
    %c0_27 = arith.constant 0 : index
    %163 = vector.load %arg2[%c6, %c0_27] : memref<10x32xf32, #tpu.memory_space<vmem>>, vector<1x32xf32>
    tpu.vector_store %arg2[%c6, %c0_27], %162 {strides = array<i32>} : memref<10x32xf32, #tpu.memory_space<vmem>>, vector<1x32xf32>,
    %164 = vector.extract_strided_slice %9 {offsets = [7, 0], sizes = [1, 128], strides = [1, 1]} : vector<8x128xf32> to vector<1x128xf32>
    %cst_28 = arith.constant dense<0.000000e+00> : vector<1x128xf32>
    %165 = tpu.matmul %160, %1, %cst_28 {dimension_numbers = #tpu.dot_dimension_numbers<[1], [0], [0], [1], [0, 0, 1, 1], [], []>} : vector<1x32xf32>, vector<32x128xf32>, vector<1x128xf32> -> vector<1x128xf32>
    %166 = arith.addf %164, %165 : vector<1x128xf32>
    %167 = vector.extract_strided_slice %166 {offsets = [0, 0], sizes = [1, 96], strides = [1, 1]} : vector<1x128xf32> to vector<1x96xf32>
    %168 = arith.negf %167 : vector<1x96xf32>
    %169 = math.exp %168 : vector<1x96xf32>
    %cst_29 = arith.constant 1.000000e+00 : f32
    %170 = vector.broadcast %cst_29 : f32 to vector<1x96xf32>
    %171 = arith.addf %170, %169 : vector<1x96xf32>
    %172 = arith.divf %170, %171 : vector<1x96xf32>
    %173 = vector.extract_strided_slice %172 {offsets = [0, 0], sizes = [1, 32], strides = [1, 1]} : vector<1x96xf32> to vector<1x32xf32>
    %174 = vector.extract_strided_slice %172 {offsets = [0, 32], sizes = [1, 32], strides = [1, 1]} : vector<1x96xf32> to vector<1x32xf32>
    %175 = vector.extract_strided_slice %172 {offsets = [0, 64], sizes = [1, 32], strides = [1, 1]} : vector<1x96xf32> to vector<1x32xf32>
    %176 = vector.extract_strided_slice %166 {offsets = [0, 96], sizes = [1, 32], strides = [1, 1]} : vector<1x128xf32> to vector<1x32xf32>
    %177 = math.tanh %176 : vector<1x32xf32>
    %178 = arith.mulf %174, %158 : vector<1x32xf32>
    %179 = arith.mulf %173, %177 : vector<1x32xf32>
    %180 = arith.addf %178, %179 : vector<1x32xf32>
    %181 = math.tanh %180 : vector<1x32xf32>
    %182 = arith.mulf %175, %181 : vector<1x32xf32>
    %183 = math.absf %182 : vector<1x32xf32>
    %184 = arith.divf %182, %183 : vector<1x32xf32>
    %c7 = arith.constant 7 : index
    %c0_30 = arith.constant 0 : index
    %185 = vector.load %arg2[%c7, %c0_30] : memref<10x32xf32, #tpu.memory_space<vmem>>, vector<1x32xf32>
    tpu.vector_store %arg2[%c7, %c0_30], %184 {strides = array<i32>} : memref<10x32xf32, #tpu.memory_space<vmem>>, vector<1x32xf32>,
    %c8 = arith.constant 8 : index
    %c0_31 = arith.constant 0 : index
    %186 = vector.load %arg2[%c8, %c0_31] : memref<10x32xf32, #tpu.memory_space<vmem>>, vector<1x32xf32>
    tpu.vector_store %arg2[%c8, %c0_31], %182 {strides = array<i32>} : memref<10x32xf32, #tpu.memory_space<vmem>>, vector<1x32xf32>,
    %c9 = arith.constant 9 : index
    %c0_32 = arith.constant 0 : index
    %187 = vector.load %arg2[%c9, %c0_32] : memref<10x32xf32, #tpu.memory_space<vmem>>, vector<1x32xf32>
    tpu.vector_store %arg2[%c9, %c0_32], %180 {strides = array<i32>} : memref<10x32xf32, #tpu.memory_space<vmem>>, vector<1x32xf32>,
    return
  }
}

</mosaic_0001>

<bundles_post_ra>
// kernel: manager_base_forward.1
= control target key start
LH: loop header
LB: loop body
LE: loop exit
PB: predicated region body
PF: predicated region fallthrough
CT: control target
= control target key end

     0   :  { %v1334_v0 = vmov 0.0|0.0   ;;  %vm1335_vm0 = vmmov 0   ;;  %v1336_v8 = vmov 0.0   ;;  %vm26_vm1 = vcmask 261120   ;;  %s1337_s30 = smov 32   ;;  %s1339_s17 = smov 96   ;;  %s1563_s1 = inlined_call_operand.vmem [shape: f32[66,128], index: 1, kind: input, shape index: {}]   ;;  %s1564_s0 = inlined_call_operand.vmem [shape: f32[8,32], index: 0, kind: input, shape index: {}]   ;;  %s1565_s2 = inlined_call_operand.vmem [shape: f32[10,32], index: 2, kind: output, shape index: {}]  }
   0x1   :  { %1194 = vmatprep.subr.bf16.mxu0 %v1334_v0  ;;  %v11_v1 = vld [vmem:[%s1563_s1] sm:$0xff]  ;;  %v12_v2 = vld [vmem:[%s1563_s1 + $0x8] sm:$0xff]  ;;  %1200 = vmatprep.subr.bf16.mxu1 %v1334_v0  ;;  %v13_v6 = vld [vmem:[%s1563_s1 + $0x10] sm:$0xff]  ;;  %vm205_vm2 = vcmask 253952   ;;  %vm436_vm3 = vcmask 256002   ;;  %vm668_vm4 = vcmask 258052  }
   0x2   :  { %v15_v3 = vld [vmem:[%s1563_s1 + $0x20] sm:$0xff]  ;;  %v1195_v4 = vpack.c.bf16 %v12_v2, %v11_v1  ;;  %v16_v5 = vld [vmem:[%s1563_s1 + $0x28] sm:$0xff]  ;;  %v14_v7 = vld [vmem:[%s1563_s1 + $0x18] sm:$0xff]  ;;  %1103 = vmatprep.mubr.msk.f32.mxu0 %vm1335_vm0, %v1336_v8  ;;  %1114 = vmatprep.mubr.msk.f32.mxu1 %vm1335_vm0, %v1336_v8  ;;  %vm900_vm5 = vcmask 260102   ;;  %vm320_vm6 = vcmask 254977   ;;  %vm552_vm7 = vcmask 257027  }
   0x3   :  { %v1379_v9 = vpack.c.bf16 %v16_v5, %v15_v3  ;;  %v17_v10 = vld [vmem:[%s1563_s1 + $0x30] sm:$0xff]  ;;  %v18_v11 = vld [vmem:[%s1563_s1 + $0x38] sm:$0xff]  ;;  %v1198_v12 = vpack.c.bf16 %v14_v7, %v13_v6  ;;  %v21_v14 = vld [vmem:[%s1564_s0] sm:$0xff]  ;;  %vm784_vm8 = vcmask 259077   ;;  %vm1016_vm9 = vcmask 261127  }
   0x4   :  { %1196 = vmatpush3.bf16.msra.mxu0 %v1195_v4  ;;  %v1389_v13 = vpack.c.bf16 %v18_v11, %v17_v10  ;;  %v20_v15 = vld [vmem:[%s1563_s1 + $0x41] sm:$0x1]  ;;  %v1032_v16 = vld [vmem:[%s1563_s1 + $0x40] ss:$0 sm:$0xff]  ;;  %s1338_s1 = smov 64  }
   0x5   :  { %1202 = vmatpush3.bf16.msra.mxu1 %v1379_v9  ;;  %1197 = vmatprep.subr.bf16.mxu0 %v1334_v0 }
   0x6   :  { %1203 = vmatprep.subr.bf16.mxu1 %v1334_v0 }
   0x8   :  { %1199 = vmatpush3.bf16.msra.mxu0 %v1198_v12 }
   0x9   :  { %1205 = vmatpush3.bf16.msra.mxu1 %v1389_v13  ;;  %1206 = vmatprep.subr.bf16.mxu0 %v1334_v0 }
   0xa   :  { %1212 = vmatprep.subr.bf16.mxu1 %v1334_v0 }
   0xb   :  { %1104 = vmatmul.mubr.msk.f32.vlgmr.msra.gmra.mrb[0].mxu0 %vm26_vm1, %v21_v14 }
   0xc   :  { %1115 = vmatmul.mubr.msk.f32.vlgmr.msra.gmra.mrb[0].mxu1 %vm26_vm1, %v20_v15  ;;  %1208 = vmatpush3.bf16.msra.mxu0 %v1379_v9 }
   0xd   :  { %1209 = vmatprep.subr.bf16.mxu0 %v1334_v0  ;;  %1125 = vmatprep.mubr.msk.f32.mxu0 %vm1335_vm0, %v1336_v8 }
   0xe   :  { %1214 = vmatpush3.bf16.msra.mxu1 %v1379_v9  ;;  %1136 = vmatprep.mubr.msk.f32.mxu1 %vm1335_vm0, %v1336_v8 }
   0xf   :  { %1215 = vmatprep.subr.bf16.mxu1 %v1334_v0 }
  0x10   :  { %1211 = vmatpush3.bf16.msra.mxu0 %v1389_v13 }
  0x11   :  { %1218 = vmatprep.subr.bf16.mxu0 %v1334_v0 }
  0x12   :  { %1217 = vmatpush3.bf16.msra.mxu1 %v1389_v13 }
  0x13   :  { %1224 = vmatprep.subr.bf16.mxu1 %v1334_v0 }
  0xde   :  { %v96_v17 = vpop.f32.mrb[0].mxu0 }
  0xdf   :  { %v1418_v18 = vadd.f32 %v1032_v16, %v96_v17  ;;  %v1105_v19 = vpop.f32.mrb[1].mxu0  ;;  %v169_v20 = vpop.f32.mrb[0].mxu1 }
  0xe0   :  { %v1116_v21 = vpop.f32.mrb[1].mxu1 }
  0xe1   :  { %v173_v22 = vadd.f32 %v169_v20, %v1418_v18 }
  0xe3   :  { %1254 = vtanh.f32 %v173_v22  ;;  %v1035_v24 = vmul.f32 -1.442695, %v173_v22 }
  0xe5   :  { %1256 = vpow2.f32 %v1035_v24 }
  0xed   :  { %v1255_v23 = vpop.eup %1254 }
  0xee   :  { %183 = vrot.lane.b32.xlu0 %v1255_v23, %s1337_s30 }
  0xef   :  { %v1257_v25 = vpop.eup %1256 }
  0xf0   :  { %v177_v26 = vadd.f32 1.0, %v1257_v25 }
  0xf2   :  { %1258 = vrcp.f32 %v177_v26 }
  0xfc   :  { %v1259_v27 = vpop.eup %1258 }
  0xfd   :  { %v181_v30 = vmul.f32 %v1259_v27, %v20_v15 }
 0x160   :  { %v184_v28 = vpop.permute.xlu0 %183 }
 0x161   :  { %v186_v29 = vmul.f32 %v1259_v27, %v184_v28 }
 0x163   :  { %188 = vrot.lane.b32.xlu0 %v186_v29, %s1337_s30 }
 0x1d5   :  { %v189_v31 = vpop.permute.xlu0 %188 }
 0x1d6   :  { %v191_v32 = vadd.f32 %v189_v31, %v181_v30 }
 0x1d8   :  { %1260 = vtanh.f32 %v191_v32  ;;  %v294_v48 = vrot.slane %v191_v32, 7 }
 0x1e2   :  { %v1261_v33 = vpop.eup %1260 }
 0x1e3   :  { %194 = vrot.lane.b32.xlu1 %v1261_v33, %s1337_s30 }
 0x255   :  { %v195_v34 = vpop.permute.xlu1 %194 }
 0x256   :  { %v1424_v35 = vmul.f32 %v1259_v27, %v195_v34 }
 0x258   :  { %208 = vrot.lane.b32.xlu1 %v1424_v35, %s1338_s1 }
 0x2ca   :  { %v209_v36 = vpop.permute.xlu1 %208 }
 0x2cb   :  { %1126 = vmatmul.mubr.msk.f32.vlgmr.msra.gmra.mrb[2].mxu0 %vm26_vm1, %v209_v36 }
 0x2cc   :  { %1220 = vmatpush3.bf16.msra.mxu0 %v1379_v9  ;;  %1147 = vmatprep.mubr.msk.f32.mxu0 %vm1335_vm0, %v1336_v8 }
 0x2cd   :  { %1221 = vmatprep.subr.bf16.mxu0 %v1334_v0 }
 0x2d0   :  { %1223 = vmatpush3.bf16.msra.mxu0 %v1389_v13 }
 0x2d1   :  { %1230 = vmatprep.subr.bf16.mxu0 %v1334_v0 }
 0x39e   :  { %v278_v37 = vpop.f32.mrb[2].mxu0 }
 0x39f   :  { %v283_v38 = vrot.slane %v278_v37, 7  ;;  %v1127_v39 = vpop.f32.mrb[3].mxu0 }
 0x3a1   :  { %v285_v40 = vadd.f32 %v283_v38, %v1418_v18 }
 0x3a3   :  { %1262 = vtanh.f32 %v285_v40  ;;  %v1037_v42 = vmul.f32 -1.442695, %v285_v40 }
 0x3a5   :  { %1264 = vpow2.f32 %v1037_v42 }
 0x3ad   :  { %v1263_v41 = vpop.eup %1262 }
 0x3ae   :  { %298 = vrot.lane.b32.xlu0 %v1263_v41, %s1337_s30 }
 0x3af   :  { %v1265_v43 = vpop.eup %1264 }
 0x3b0   :  { %v289_v44 = vadd.f32 1.0, %v1265_v43 }
 0x3b2   :  { %1266 = vrcp.f32 %v289_v44 }
 0x3bc   :  { %v1267_v45 = vpop.eup %1266 }
 0x3bd   :  { %v296_v49 = vmul.f32 %v1267_v45, %v294_v48 }
 0x420   :  { %v299_v46 = vpop.permute.xlu0 %298 }
 0x421   :  { %v301_v47 = vmul.f32 %v1267_v45, %v299_v46 }
 0x423   :  { %303 = vrot.lane.b32.xlu1 %v301_v47, %s1337_s30 }
 0x495   :  { %v304_v50 = vpop.permute.xlu1 %303 }
 0x496   :  { %v306_v51 = vadd.f32 %v304_v50, %v296_v49 }
 0x498   :  { %1268 = vtanh.f32 %v306_v51  ;;  %v410_v5 = vrot.slane %v306_v51, 7 }
 0x4a2   :  { %v1269_v52 = vpop.eup %1268 }
 0x4a3   :  { %309 = vrot.lane.b32.xlu0 %v1269_v52, %s1337_s30 }
 0x515   :  { %v310_v53 = vpop.permute.xlu0 %309 }
 0x516   :  { %v1439_v54 = vmul.f32 %v1267_v45, %v310_v53 }
 0x518   :  { %v323_v55 = vrot.slane %v1439_v54, 1 }
 0x51a   :  { %324 = vrot.lane.b32.xlu1 %v323_v55, %s1338_s1 }
 0x58c   :  { %v325_v56 = vpop.permute.xlu1 %324 }
 0x58d   :  { %1137 = vmatmul.mubr.msk.f32.vlgmr.msra.gmra.mrb[2].mxu1 %vm26_vm1, %v325_v56 }
 0x58e   :  { %1226 = vmatpush3.bf16.msra.mxu1 %v1379_v9  ;;  %1158 = vmatprep.mubr.msk.f32.mxu1 %vm1335_vm0, %v1336_v8 }
 0x58f   :  { %1227 = vmatprep.subr.bf16.mxu1 %v1334_v0 }
 0x592   :  { %1229 = vmatpush3.bf16.msra.mxu1 %v1389_v13 }
 0x593   :  { %1236 = vmatprep.subr.bf16.mxu1 %v1334_v0 }
 0x660   :  { %v394_v57 = vpop.f32.mrb[2].mxu1 }
 0x661   :  { %v399_v58 = vrot.slane %v394_v57, 6  ;;  %v1138_v59 = vpop.f32.mrb[3].mxu1 }
 0x663   :  { %v401_v60 = vadd.f32 %v399_v58, %v1418_v18 }
 0x665   :  { %1270 = vtanh.f32 %v401_v60  ;;  %v1039_v62 = vmul.f32 -1.442695, %v401_v60 }
 0x667   :  { %1272 = vpow2.f32 %v1039_v62 }
 0x66f   :  { %v1271_v61 = vpop.eup %1270 }
 0x670   :  { %414 = vrot.lane.b32.xlu0 %v1271_v61, %s1337_s30 }
 0x671   :  { %v1273_v63 = vpop.eup %1272 }
 0x672   :  { %v405_v1 = vadd.f32 1.0, %v1273_v63 }
 0x674   :  { %1274 = vrcp.f32 %v405_v1 }
 0x67e   :  { %v1275_v2 = vpop.eup %1274 }
 0x67f   :  { %v412_v6 = vmul.f32 %v1275_v2, %v410_v5 }
 0x6e2   :  { %v415_v3 = vpop.permute.xlu0 %414 }
 0x6e3   :  { %v417_v4 = vmul.f32 %v1275_v2, %v415_v3 }
 0x6e5   :  { %419 = vrot.lane.b32.xlu1 %v417_v4, %s1337_s30 }
 0x757   :  { %v420_v7 = vpop.permute.xlu1 %419 }
 0x758   :  { %v422_v10 = vadd.f32 %v420_v7, %v412_v6 }
 0x75a   :  { %1276 = vtanh.f32 %v422_v10  ;;  %v526_v29 = vrot.slane %v422_v10, 7 }
 0x764   :  { %v1277_v11 = vpop.eup %1276 }
 0x765   :  { %425 = vrot.lane.b32.xlu0 %v1277_v11, %s1337_s30 }
 0x7d7   :  { %v426_v12 = vpop.permute.xlu0 %425 }
 0x7d8   :  { %v1454_v14 = vmul.f32 %v1275_v2, %v426_v12 }
 0x7da   :  { %v439_v15 = vrot.slane %v1454_v14, 2 }
 0x7dc   :  { %440 = vrot.lane.b32.xlu1 %v439_v15, %s1338_s1 }
 0x84e   :  { %v441_v16 = vpop.permute.xlu1 %440 }
 0x84f   :  { %1148 = vmatmul.mubr.msk.f32.vlgmr.msra.gmra.mrb[4].mxu0 %vm26_vm1, %v441_v16 }
 0x850   :  { %1232 = vmatpush3.bf16.msra.mxu0 %v1379_v9  ;;  %1169 = vmatprep.mubr.msk.f32.mxu0 %vm1335_vm0, %v1336_v8 }
 0x851   :  { %1233 = vmatprep.subr.bf16.mxu0 %v1334_v0 }
 0x854   :  { %1235 = vmatpush3.bf16.msra.mxu0 %v1389_v13 }
 0x855   :  { %1242 = vmatprep.subr.bf16.mxu0 %v1334_v0 }
 0x922   :  { %v510_v17 = vpop.f32.mrb[4].mxu0 }
 0x923   :  { %v515_v19 = vrot.slane %v510_v17, 5  ;;  %v1149_v20 = vpop.f32.mrb[5].mxu0 }
 0x925   :  { %v517_v21 = vadd.f32 %v515_v19, %v1418_v18 }
 0x927   :  { %1278 = vtanh.f32 %v517_v21  ;;  %v1041_v23 = vmul.f32 -1.442695, %v517_v21 }
 0x929   :  { %1280 = vpow2.f32 %v1041_v23 }
 0x931   :  { %v1279_v22 = vpop.eup %1278 }
 0x932   :  { %530 = vrot.lane.b32.xlu0 %v1279_v22, %s1337_s30 }
 0x933   :  { %v1281_v24 = vpop.eup %1280 }
 0x934   :  { %v521_v25 = vadd.f32 1.0, %v1281_v24 }
 0x936   :  { %1282 = vrcp.f32 %v521_v25 }
 0x940   :  { %v1283_v26 = vpop.eup %1282 }
 0x941   :  { %v528_v30 = vmul.f32 %v1283_v26, %v526_v29 }
 0x9a4   :  { %v531_v27 = vpop.permute.xlu0 %530 }
 0x9a5   :  { %v533_v28 = vmul.f32 %v1283_v26, %v531_v27 }
 0x9a7   :  { %535 = vrot.lane.b32.xlu1 %v533_v28, %s1337_s30 }
 0xa19   :  { %v536_v31 = vpop.permute.xlu1 %535 }
 0xa1a   :  { %v538_v32 = vadd.f32 %v536_v31, %v528_v30 }
 0xa1c   :  { %1284 = vtanh.f32 %v538_v32  ;;  %v642_v50 = vrot.slane %v538_v32, 7 }
 0xa26   :  { %v1285_v33 = vpop.eup %1284 }
 0xa27   :  { %541 = vrot.lane.b32.xlu0 %v1285_v33, %s1337_s30 }
 0xa99   :  { %v542_v34 = vpop.permute.xlu0 %541 }
 0xa9a   :  { %v1469_v36 = vmul.f32 %v1283_v26, %v542_v34 }
 0xa9c   :  { %v555_v37 = vrot.slane %v1469_v36, 3 }
 0xa9e   :  { %556 = vrot.lane.b32.xlu1 %v555_v37, %s1338_s1 }
 0xb10   :  { %v557_v38 = vpop.permute.xlu1 %556 }
 0xb11   :  { %1159 = vmatmul.mubr.msk.f32.vlgmr.msra.gmra.mrb[4].mxu1 %vm26_vm1, %v557_v38 }
 0xb12   :  { %1238 = vmatpush3.bf16.msra.mxu1 %v1379_v9  ;;  %1180 = vmatprep.mubr.msk.f32.mxu1 %vm1335_vm0, %v1336_v8 }
 0xb13   :  { %1239 = vmatprep.subr.bf16.mxu1 %v1334_v0 }
 0xb16   :  { %1241 = vmatpush3.bf16.msra.mxu1 %v1389_v13 }
 0xbe4   :  { %v626_v39 = vpop.f32.mrb[4].mxu1 }
 0xbe5   :  { %v631_v40 = vrot.slane %v626_v39, 4  ;;  %v1160_v41 = vpop.f32.mrb[5].mxu1 }
 0xbe7   :  { %v633_v42 = vadd.f32 %v631_v40, %v1418_v18 }
 0xbe9   :  { %1286 = vtanh.f32 %v633_v42  ;;  %v1043_v44 = vmul.f32 -1.442695, %v633_v42 }
 0xbeb   :  { %1288 = vpow2.f32 %v1043_v44 }
 0xbf3   :  { %v1287_v43 = vpop.eup %1286 }
 0xbf4   :  { %646 = vrot.lane.b32.xlu0 %v1287_v43, %s1337_s30 }
 0xbf5   :  { %v1289_v45 = vpop.eup %1288 }
 0xbf6   :  { %v637_v46 = vadd.f32 1.0, %v1289_v45 }
 0xbf8   :  { %1290 = vrcp.f32 %v637_v46 }
 0xc02   :  { %v1291_v47 = vpop.eup %1290 }
 0xc03   :  { %v644_v51 = vmul.f32 %v1291_v47, %v642_v50 }
 0xc66   :  { %v647_v48 = vpop.permute.xlu0 %646 }
 0xc67   :  { %v649_v49 = vmul.f32 %v1291_v47, %v647_v48  ;;  %v198_v48 = vand.u32 2147483647, %v1424_v35 }
 0xc69   :  { %651 = vrot.lane.b32.xlu1 %v649_v49, %s1337_s30  ;;  %v429_v49 = vand.u32 2147483647, %v1454_v14 }
 0xcdb   :  { %v652_v52 = vpop.permute.xlu1 %651 }
 0xcdc   :  { %v654_v53 = vadd.f32 %v652_v52, %v644_v51 }
 0xcde   :  { %1292 = vtanh.f32 %v654_v53 }
 0xce8   :  { %v1293_v55 = vpop.eup %1292 }
 0xce9   :  { %657 = vrot.lane.b32.xlu0 %v1293_v55, %s1337_s30 }
 0xd5b   :  { %v658_v56 = vpop.permute.xlu0 %657 }
 0xd5c   :  { %v1483_v57 = vmul.f32 %v1291_v47, %v658_v56 }
 0xd5e   :  { %v671_v58 = vrot.slane %v1483_v57, 4  ;;  %v661_v50 = vand.u32 2147483647, %v1483_v57 }
 0xd60   :  { %672 = vrot.lane.b32.xlu1 %v671_v58, %s1338_s1 }
 0xdd2   :  { %v673_v59 = vpop.permute.xlu1 %672 }
 0xdd3   :  { %1170 = vmatmul.mubr.msk.f32.vlgmr.msra.gmra.mrb[6].mxu0 %vm26_vm1, %v673_v59 }
 0xdd4   :  { %1244 = vmatpush3.bf16.msra.mxu0 %v1379_v9  ;;  %1191 = vmatprep.mubr.msk.f32.mxu0 %vm1335_vm0, %v1336_v8 }
 0xdd5   :  { %1245 = vmatprep.subr.bf16.mxu0 %v1334_v0  ;;  %v758_v0 = vrot.slane %v654_v53, 7 }
 0xdd8   :  { %1247 = vmatpush3.bf16.msra.mxu0 %v1389_v13 }
 0xea6   :  { %v742_v60 = vpop.f32.mrb[6].mxu0 }
 0xea7   :  { %v747_v61 = vrot.slane %v742_v60, 3  ;;  %v1171_v62 = vpop.f32.mrb[7].mxu0 }
 0xea9   :  { %v749_v63 = vadd.f32 %v747_v61, %v1418_v18 }
 0xeab   :  { %1294 = vtanh.f32 %v749_v63  ;;  %v1045_v2 = vmul.f32 -1.442695, %v749_v63 }
 0xead   :  { %1296 = vpow2.f32 %v1045_v2  ;;  %v313_v2 = vand.u32 2147483647, %v1439_v54 }
 0xeb5   :  { %v1295_v1 = vpop.eup %1294 }
 0xeb6   :  { %762 = vrot.lane.b32.xlu0 %v1295_v1, %s1337_s30 }
 0xeb7   :  { %v1297_v3 = vpop.eup %1296 }
 0xeb8   :  { %v753_v9 = vadd.f32 1.0, %v1297_v3 }
 0xeba   :  { %1298 = vrcp.f32 %v753_v9 }
 0xec4   :  { %v1299_v4 = vpop.eup %1298 }
 0xec5   :  { %v760_v13 = vmul.f32 %v1299_v4, %v758_v0 }
 0xf28   :  { %v763_v8 = vpop.permute.xlu0 %762 }
 0xf29   :  { %v765_v5 = vmul.f32 %v1299_v4, %v763_v8 }
 0xf2b   :  { %767 = vrot.lane.b32.xlu1 %v765_v5, %s1337_s30 }
 0xf9d   :  { %v768_v6 = vpop.permute.xlu1 %767 }
 0xf9e   :  { %v770_v7 = vadd.f32 %v768_v6, %v760_v13 }
 0xfa0   :  { %1300 = vtanh.f32 %v770_v7  ;;  %v874_v29 = vrot.slane %v770_v7, 7 }
 0xfaa   :  { %v1301_v10 = vpop.eup %1300 }
 0xfab   :  { %773 = vrot.lane.b32.xlu0 %v1301_v10, %s1337_s30 }
0x101d   :  { %v774_v11 = vpop.permute.xlu0 %773 }
0x101e   :  { %v1497_v12 = vmul.f32 %v1299_v4, %v774_v11 }
0x1020   :  { %v787_v15 = vrot.slane %v1497_v12, 5 }
0x1022   :  { %788 = vrot.lane.b32.xlu1 %v787_v15, %s1338_s1 }
0x1094   :  { %v789_v16 = vpop.permute.xlu1 %788 }
0x1095   :  { %1181 = vmatmul.mubr.msk.f32.vlgmr.msra.gmra.mrb[6].mxu1 %vm26_vm1, %v789_v16 }
0x1168   :  { %v858_v17 = vpop.f32.mrb[6].mxu1 }
0x1169   :  { %v863_v19 = vrot.slane %v858_v17, 2  ;;  %v1182_v20 = vpop.f32.mrb[7].mxu1 }
0x116b   :  { %v865_v21 = vadd.f32 %v863_v19, %v1418_v18 }
0x116d   :  { %1302 = vtanh.f32 %v865_v21  ;;  %v1047_v23 = vmul.f32 -1.442695, %v865_v21 }
0x116f   :  { %1304 = vpow2.f32 %v1047_v23 }
0x1177   :  { %v1303_v22 = vpop.eup %1302 }
0x1178   :  { %878 = vrot.lane.b32.xlu0 %v1303_v22, %s1337_s30 }
0x1179   :  { %v1305_v24 = vpop.eup %1304 }
0x117a   :  { %v869_v25 = vadd.f32 1.0, %v1305_v24 }
0x117c   :  { %1306 = vrcp.f32 %v869_v25 }
0x1186   :  { %v1307_v26 = vpop.eup %1306 }
0x1187   :  { %v876_v30 = vmul.f32 %v1307_v26, %v874_v29 }
0x11ea   :  { %v879_v27 = vpop.permute.xlu0 %878 }
0x11eb   :  { %v881_v28 = vmul.f32 %v1307_v26, %v879_v27 }
0x11ed   :  { %883 = vrot.lane.b32.xlu1 %v881_v28, %s1337_s30 }
0x125f   :  { %v884_v31 = vpop.permute.xlu1 %883 }
0x1260   :  { %v886_v32 = vadd.f32 %v884_v31, %v876_v30 }
0x1262   :  { %1308 = vtanh.f32 %v886_v32  ;;  %v990_v1 = vrot.slane %v886_v32, 7 }
0x126c   :  { %v1309_v33 = vpop.eup %1308 }
0x126d   :  { %889 = vrot.lane.b32.xlu0 %v1309_v33, %s1337_s30 }
0x12df   :  { %v890_v34 = vpop.permute.xlu0 %889 }
0x12e0   :  { %v892_v37 = vmul.f32 %v1307_v26, %v890_v34 }
0x12e2   :  { %v903_v38 = vrot.slane %v892_v37, 6 }
0x12e4   :  { %904 = vrot.lane.b32.xlu1 %v903_v38, %s1338_s1 }
0x1356   :  { %v905_v39 = vpop.permute.xlu1 %904 }
0x1357   :  { %1192 = vmatmul.mubr.msk.f32.vlgmr.msra.gmra.mrb[8].mxu0 %vm26_vm1, %v905_v39 }
0x142a   :  { %v974_v40 = vpop.f32.mrb[8].mxu0 }
0x142b   :  { %v979_v41 = vrot.slane %v974_v40, 1  ;;  %v1193_v42 = vpop.f32.mrb[9].mxu0 }
0x142d   :  { %v981_v43 = vadd.f32 %v979_v41, %v1418_v18  ;;  %v893_v18 = vand.u32 2147483647, %v892_v37 }
0x142f   :  { %1310 = vtanh.f32 %v981_v43  ;;  %v1049_v45 = vmul.f32 -1.442695, %v981_v43 }
0x1431   :  { %1312 = vpow2.f32 %v1049_v45 }
0x1439   :  { %v1311_v44 = vpop.eup %1310 }
0x143a   :  { %994 = vrot.lane.b32.xlu0 %v1311_v44, %s1337_s30 }
0x143b   :  { %v1313_v46 = vpop.eup %1312 }
0x143c   :  { %v985_v47 = vadd.f32 1.0, %v1313_v46 }
0x143e   :  { %1314 = vrcp.f32 %v985_v47 }
0x143f   :  { %1316 = vrcp.f32 %v198_v48 }
0x1440   :  { %1318 = vrcp.f32 %v429_v49 }
0x1441   :  { %1320 = vrcp.f32 %v661_v50 }
0x1442   :  { %1322 = vrcp.f32 %v893_v18 }
0x1443   :  { %1324 = vrcp.f32 %v313_v2 }
0x1448   :  { %v1315_v51 = vpop.eup %1314 }
0x1449   :  { %v1317_v55 = vpop.eup %1316 }
0x144a   :  { %v200_v56 = vmul.f32 %v1317_v55, %v1424_v35  ;;  %v1319_v58 = vpop.eup %1318  ;;  %v992_v35 = vmul.f32 %v1315_v51, %v990_v1 }
0x144b   :  { %v431_v59 = vmul.f32 %v1319_v58, %v1454_v14  ;;  %v1321_v60 = vpop.eup %1320  ;;  %v545_v14 = vand.u32 2147483647, %v1469_v36 }
0x144c   :  { %v663_v61 = vmul.f32 %v1321_v60, %v1483_v57  ;;  %v1323_v62 = vpop.eup %1322  ;;  %v777_v57 = vand.u32 2147483647, %v1497_v12 }
0x144d   :  { %v895_v63 = vmul.f32 %v1323_v62, %v892_v37  ;;  %v1325_v5 = vpop.eup %1324 }
0x144e   :  { %v315_v7 = vmul.f32 %v1325_v5, %v1439_v54 }
0x14ac   :  { %v995_v52 = vpop.permute.xlu0 %994 }
0x14ad   :  { %v997_v53 = vmul.f32 %v1315_v51, %v995_v52 }
0x14af   :  { %999 = vrot.lane.b32.xlu1 %v997_v53, %s1337_s30 }
0x14b3   :  { %202 = vrot.lane.b32.xlu1 %v200_v56, %s1338_s1 }
0x14b7   :  { %433 = vrot.lane.b32.xlu1 %v431_v59, %s1338_s1 }
0x14bb   :  { %665 = vrot.lane.b32.xlu1 %v663_v61, %s1338_s1 }
0x14bf   :  { %897 = vrot.lane.b32.xlu1 %v895_v63, %s1338_s1 }
0x1521   :  { %v1000_v3 = vpop.permute.xlu1 %999 }
0x1522   :  { %v1002_v9 = vadd.f32 %v1000_v3, %v992_v35 }
0x1524   :  { %1326 = vtanh.f32 %v1002_v9 }
0x1525   :  { %v203_v4 = vpop.permute.xlu1 %202  ;;  %1328 = vrcp.f32 %v545_v14 }
0x1526   :  { %206 = vst.msk [vmem:[%s1565_s2] sm:$0x1] %vm205_vm2, %v203_v4  ;;  %1330 = vrcp.f32 %v777_v57 }
0x1529   :  { %v434_v8 = vpop.permute.xlu1 %433 }
0x152a   :  { %437 = vst.msk [vmem:[%s1565_s2] sm:$0x4] %vm436_vm3, %v434_v8 }
0x152d   :  { %v666_v0 = vpop.permute.xlu1 %665 }
0x152e   :  { %v1327_v13 = vpop.eup %1326  ;;  %669 = vst.msk [vmem:[%s1565_s2] sm:$0x10] %vm668_vm4, %v666_v0 }
0x152f   :  { %1005 = vrot.lane.b32.xlu0 %v1327_v13, %s1337_s30  ;;  %v1329_v10 = vpop.eup %1328 }
0x1530   :  { %v547_v11 = vmul.f32 %v1329_v10, %v1469_v36  ;;  %v1331_v15 = vpop.eup %1330 }
0x1531   :  { %v898_v6 = vpop.permute.xlu1 %897  ;;  %v779_v16 = vmul.f32 %v1331_v15, %v1497_v12 }
0x1532   :  { %901 = vst.msk [vmem:[%s1565_s2] sm:$0x40] %vm900_vm5, %v898_v6 }
0x1533   :  { %317 = vrot.lane.b32.xlu0 %v315_v7, %s1338_s1 }
0x1537   :  { %549 = vrot.lane.b32.xlu0 %v547_v11, %s1338_s1 }
0x153b   :  { %781 = vrot.lane.b32.xlu0 %v779_v16, %s1338_s1 }
0x15a1   :  { %v1006_v17 = vpop.permute.xlu0 %1005 }
0x15a2   :  { %v1008_v19 = vmul.f32 %v1315_v51, %v1006_v17 }
0x15a4   :  { %v1009_v54 = vand.u32 2147483647, %v1008_v19  ;;  %1019 = vrot.lane.b32.xlu1 %v1008_v19, %s1338_s1 }
0x15a5   :  { %v318_v20 = vpop.permute.xlu0 %317 }
0x15a6   :  { %1332 = vrcp.f32 %v1009_v54  ;;  %321 = vst.msk [vmem:[%s1565_s2] sm:$0x2] %vm320_vm6, %v318_v20 }
0x15a9   :  { %v550_v36 = vpop.permute.xlu0 %549 }
0x15aa   :  { %553 = vst.msk [vmem:[%s1565_s2] sm:$0x8] %vm552_vm7, %v550_v36 }
0x15ad   :  { %v782_v12 = vpop.permute.xlu0 %781 }
0x15ae   :  { %785 = vst.msk [vmem:[%s1565_s2] sm:$0x20] %vm784_vm8, %v782_v12 }
0x15b0   :  { %v1333_v21 = vpop.eup %1332 }
0x15b1   :  { %v1011_v22 = vmul.f32 %v1333_v21, %v1008_v19 }
0x15b3   :  { %1013 = vrot.lane.b32.xlu0 %v1011_v22, %s1338_s1 }
0x15b7   :  { %1024 = vrot.lane.b32.xlu0 %v1002_v9, %s1339_s17 }
0x1616   :  { %v1020_v23 = vpop.permute.xlu1 %1019 }
0x1617   :  { %1022 = vst.msk [vmem:[%s1565_s2 + $0x1] sm:$0x80] %vm1016_vm9, %v1020_v23 }
0x1625   :  { %v1014_v24 = vpop.permute.xlu0 %1013 }
0x1626   :  { %1017 = vst.msk [vmem:[%s1565_s2] sm:$0x80] %vm1016_vm9, %v1014_v24 }
0x1629   :  { %v1025_v25 = vpop.permute.xlu0 %1024 }
0x162a   :  { %1027 = vst.msk [vmem:[%s1565_s2 + $0x2] sm:$0x80] %vm1016_vm9, %v1025_v25 }

</bundles_post_ra>
